<compile_context>
chip_gen: v7x
topology: tpu7x:2x2x1
jax: 0.10.0
libtpu: 0.0.40
codegen_flags: <defaults>
</compile_context>

<pallas_src>
import functools
import math

import jax
import jax.numpy as jnp
from jax.experimental import pallas as pl
from jax.experimental.pallas import tpu as pltpu


# ----------------------------- Pallas kernel ------------------------------ #
def _linear_kernel(x_ref, w_ref, b_ref, o_ref, acc_ref):
    # x_ref: (tm, tk) input dtype, w_ref: (tk, tn) bf16, b_ref: (1, tn) f32,
    # o_ref: (tm, tn) caller dtype, acc_ref: (tm, tn) f32 scratch.
    k = pl.program_id(2)

    @pl.when(k == 0)
    def _():
        acc_ref[...] = jnp.zeros_like(acc_ref)

    # Cast activations to bf16 in-kernel (free VPU filler under the MXU),
    # accumulate in f32 on the MXU.
    acc_ref[...] += jnp.dot(x_ref[...].astype(jnp.bfloat16), w_ref[...],
                            preferred_element_type=jnp.float32)

    @pl.when(k == pl.num_programs(2) - 1)
    def _():
        o_ref[...] = (acc_ref[...] + b_ref[...]).astype(o_ref.dtype)


# ------------------------------ tiling helpers ----------------------------- #
def _round_up(x, m):
    return (x + m - 1) // m * m


def _vmem_budget_bytes():
    """75% of physical VMEM, capped — leaves headroom for Mosaic scratch.
    ~48 MiB on v7x (64 MiB physical), ~96 MiB on v5e/v6e (128 MiB)."""
    try:
        cap = pltpu.get_tpu_info().vmem_capacity_bytes
    except Exception:
        cap = 64 * 1024 * 1024  # conservative default (v7x per-core VMEM)
    return int(min(3 * cap // 4, 112 * 1024 * 1024))


def _pick_tn(n_pad):
    """Wide lane tiles, but prefer >=2 N tiles so both v7x cores get work."""
    for cand in (512, 256, 128):
        if n_pad % cand == 0 and n_pad // cand >= 2:
            return cand
    for cand in (512, 256, 128):
        if n_pad % cand == 0:
            return cand
    return 128


def _plan(m, k_pad, n_pad, x_bytes, out_bytes):
    """Pick (tm, tn, tk, M_pad, vmem_limit) from the VMEM budget."""
    budget = _vmem_budget_bytes()
    tn = _pick_tn(n_pad)
    tm = 256 if m > 128 else 128          # MXU-sized row tiles; pad small M up
    m_pad = _round_up(m, tm)

    def footprint(tk):
        # double-buffered x / w / bias tiles + double-buffered out
        # + single f32 accumulator scratch (no extra x2 factor!)
        return (2 * (tm * tk * x_bytes + tk * tn * 2 + tn * 4)
                + 2 * tm * tn * out_bytes + tm * tn * 4)

    tk = k_pad                              # full K resident: no reduction loop
    if footprint(k_pad) > budget:
        tk = 256
        for cand in (2048, 1792, 1536, 1280, 1024, 896, 768, 640, 512, 384, 256):
            if k_pad % cand == 0 and footprint(cand) <= budget:
                tk = cand
                break
    vmem_limit = int(min(budget, max(footprint(tk) + (8 << 20), 32 << 20)))
    return tm, tn, tk, m_pad, vmem_limit


# ----------------------- one-time parameter preparation -------------------- #
def prepare_linear_params(weight, bias=None):
    """Hoisted out of the hot path: weight (Nout, K) f32 -> (K_pad, Npad) bf16
    (cast BEFORE padding), bias -> (1, Npad) f32."""
    n_out, k = weight.shape
    k_pad = _round_up(k, 256)
    n_pad = _round_up(n_out, 128)
    w = weight.astype(jnp.bfloat16).T                       # (K, Nout) bf16
    w = jnp.pad(w, ((0, k_pad - k), (0, n_pad - n_out)))
    if bias is None:
        b = jnp.zeros((1, n_pad), jnp.float32)
    else:
        b = jnp.pad(bias.astype(jnp.float32).reshape(1, n_out),
                    ((0, 0), (0, n_pad - n_out)))
    return w, b


# ------------------------------ Linear wrapper ----------------------------- #
@functools.partial(jax.jit, static_argnames=("out_features",))
def custom_linear_prepared(x, w_kn, bias_row, *, out_features):
    """y = x @ W + b with W already prepared by prepare_linear_params."""
    orig_dtype = x.dtype
    *lead, k = x.shape
    k_pad, n_pad = w_kn.shape
    m = int(math.prod(lead)) if lead else 1
    x2 = x.reshape(m, k)

    x_bytes = jnp.dtype(x.dtype).itemsize
    out_bytes = jnp.dtype(orig_dtype).itemsize
    tm, tn, tk, m_pad, vmem_limit = _plan(m, k_pad, n_pad, x_bytes, out_bytes)

    if m_pad != m or k_pad != k:
        x2 = jnp.pad(x2, ((0, m_pad - m), (0, k_pad - k)))

    # N outer, M middle, K inner (reduction).  With a single M tile / full K
    # the weight is streamed from HBM exactly once.
    grid = (n_pad // tn, m_pad // tm, k_pad // tk)

    cost = pl.CostEstimate(
        flops=2 * m_pad * k_pad * n_pad,
        transcendentals=0,
        bytes_accessed=(m_pad * k_pad * x_bytes * (n_pad // tn)
                        + k_pad * n_pad * 2 * (m_pad // tm)
                        + n_pad * 4 + m_pad * n_pad * out_bytes))

    out = pl.pallas_call(
        _linear_kernel,
        out_shape=jax.ShapeDtypeStruct((m_pad, n_pad), orig_dtype),
        grid_spec=pltpu.PrefetchScalarGridSpec(
            num_scalar_prefetch=0,
            grid=grid,
            in_specs=[
                pl.BlockSpec((tm, tk), lambda j, i, kk: (i, kk)),  # activations
                pl.BlockSpec((tk, tn), lambda j, i, kk: (kk, j)),  # weight slab
                pl.BlockSpec((1, tn), lambda j, i, kk: (0, j)),    # bias row
            ],
            out_specs=pl.BlockSpec((tm, tn), lambda j, i, kk: (i, j)),
            scratch_shapes=[pltpu.VMEM((tm, tn), jnp.float32)],
        ),
        compiler_params=pltpu.CompilerParams(
            dimension_semantics=("parallel", "parallel", "arbitrary"),
            vmem_limit_bytes=vmem_limit),
        cost_estimate=cost,
    )(x2, w_kn, bias_row)

    out = out[:m, :out_features]
    return out.reshape(*lead, out_features)


def custom_linear(x, weight, bias=None):
    """Drop-in F.linear semantics (prep done in-graph; prefer preparing once
    with prepare_linear_params + custom_linear_prepared in a real model)."""
    w_kn, bias_row = prepare_linear_params(weight, bias)
    return custom_linear_prepared(x, w_kn, bias_row,
                                  out_features=weight.shape[0])


# ------------------------- Deterministic parameters ------------------------ #
def init_linear_params(key, in_features, out_features, use_bias=True):
    """Matches nn.Linear.reset_parameters: kaiming_uniform_(a=sqrt(5)) =>
    bound = 1/sqrt(fan_in) for both weight and bias."""
    bound = 1.0 / math.sqrt(in_features)
    k_w, k_b = jax.random.split(key)
    weight = jax.random.uniform(k_w, (out_features, in_features),
                                dtype=jnp.float32, minval=-bound, maxval=bound)
    bias = None
    if use_bias:
        bias = jax.random.uniform(k_b, (out_features,), dtype=jnp.float32,
                                  minval=-bound, maxval=bound)
    return weight, bias


# ---------------------------------- main ----------------------------------- #
if __name__ == "__main__":
    key = jax.random.PRNGKey(0)
    k_x, k_p = jax.random.split(key)

    # Small shapes: batch=2, seq=8, in_features=32, out_features=64.
    B, S, IN, OUT = 2, 8, 32, 64
    x = jax.random.normal(k_x, (B, S, IN), dtype=jnp.float32)
    weight, bias = init_linear_params(k_p, IN, OUT, use_bias=True)

    # Weight prep hoisted out of the hot path (done once per layer).
    w_kn, bias_row = prepare_linear_params(weight, bias)

    out = jax.block_until_ready(
        custom_linear_prepared(x, w_kn, bias_row, out_features=OUT))

    # Reference with the same bf16 operand rounding as the kernel's MXU path.
    xb = x.astype(jnp.bfloat16).astype(jnp.float32)
    wb = weight.astype(jnp.bfloat16).astype(jnp.float32)
    ref_bf16ops = jnp.einsum("bsi,oi->bso", xb, wb) + bias
    # Full-f32 reference (looser tolerance: bf16 operands is an explicit,
    # documented inference-precision choice).
    ref_f32 = jnp.einsum("bsi,oi->bso", x, weight) + bias

    assert out.shape == (B, S, OUT)
    assert out.dtype == x.dtype
    assert jnp.allclose(out, ref_bf16ops, atol=1e-3, rtol=1e-3)
    assert jnp.allclose(out, ref_f32, atol=3e-2, rtol=3e-2)

    print("KERNEL_OK")
</pallas_src>

<mosaic_0001>
module attributes {stable_mosaic.version = 11 : i64} {
  func.func @_linear_kernel(%arg0: i32, %arg1: i32, %arg2: i32, %arg3: memref<128x256xf32, #tpu.memory_space<vmem>>, %arg4: memref<256x128xbf16, #tpu.memory_space<vmem>>, %arg5: memref<1x128xf32, #tpu.memory_space<vmem>>, %arg6: memref<128x128xf32, #tpu.memory_space<vmem>>, %arg7: memref<128x128xf32, #tpu.memory_space<vmem>>) attributes {dimension_semantics = [#tpu.dimension_semantics<parallel>, #tpu.dimension_semantics<parallel>, #tpu.dimension_semantics<arbitrary>], iteration_bounds = array<i64: 1, 1, 1>, scalar_prefetch = 0 : i64, scratch_operands = 1 : i64, tpu.core_type = #tpu.core_type<tc>, window_params = [{transform_indices = @transform_0, window_bounds = array<i64: 128, 256>}, {transform_indices = @transform_1, window_bounds = array<i64: 256, 128>}, {transform_indices = @transform_2, window_bounds = array<i64: 1, 128>}, {transform_indices = @transform_3, window_bounds = array<i64: 128, 128>}]} {
    %c0_i32 = arith.constant 0 : i32
    %0 = arith.cmpi eq, %arg2, %c0_i32 : i32
    %1 = arith.extui %0 : i1 to i32
    %c0_i32_0 = arith.constant 0 : i32
    %2 = arith.cmpi ne, %1, %c0_i32_0 : i32
    scf.if %2 {
      %cst_10 = arith.constant 0.000000e+00 : f32
      %13 = vector.broadcast %cst_10 : f32 to vector<128x128xf32>
      %c0_11 = arith.constant 0 : index
      %c0_12 = arith.constant 0 : index
      %14 = vector.load %arg7[%c0_11, %c0_12] : memref<128x128xf32, #tpu.memory_space<vmem>>, vector<128x128xf32>
      tpu.vector_store %arg7[%c0_11, %c0_12], %13 {strides = array<i32>} : memref<128x128xf32, #tpu.memory_space<vmem>>, vector<128x128xf32>,
    } else {
    }
    %c0 = arith.constant 0 : index
    %c0_1 = arith.constant 0 : index
    %3 = vector.load %arg7[%c0, %c0_1] : memref<128x128xf32, #tpu.memory_space<vmem>>, vector<128x128xf32>
    %c0_2 = arith.constant 0 : index
    %c0_3 = arith.constant 0 : index
    %4 = vector.load %arg3[%c0_2, %c0_3] : memref<128x256xf32, #tpu.memory_space<vmem>>, vector<128x256xf32>
    %5 = arith.truncf %4 : vector<128x256xf32> to vector<128x256xbf16>
    %c0_4 = arith.constant 0 : index
    %c0_5 = arith.constant 0 : index
    %6 = vector.load %arg4[%c0_4, %c0_5] : memref<256x128xbf16, #tpu.memory_space<vmem>>, vector<256x128xbf16>
    %cst = arith.constant dense<0.000000e+00> : vector<128x128xf32>
    %7 = tpu.matmul %5, %6, %cst {dimension_numbers = #tpu.dot_dimension_numbers<[1], [0], [0], [1], [0, 0, 1, 1], [], []>} : vector<128x256xbf16>, vector<256x128xbf16>, vector<128x128xf32> -> vector<128x128xf32>
    %8 = arith.addf %3, %7 : vector<128x128xf32>
    %c0_6 = arith.constant 0 : index
    %c0_7 = arith.constant 0 : index
    %9 = vector.load %arg7[%c0_6, %c0_7] : memref<128x128xf32, #tpu.memory_space<vmem>>, vector<128x128xf32>
    tpu.vector_store %arg7[%c0_6, %c0_7], %8 {strides = array<i32>} : memref<128x128xf32, #tpu.memory_space<vmem>>, vector<128x128xf32>,
    %c0_i32_8 = arith.constant 0 : i32
    %10 = arith.cmpi eq, %arg2, %c0_i32_8 : i32
    %11 = arith.extui %10 : i1 to i32
    %c0_i32_9 = arith.constant 0 : i32
    %12 = arith.cmpi ne, %11, %c0_i32_9 : i32
    scf.if %12 {
      %c0_10 = arith.constant 0 : index
      %c0_11 = arith.constant 0 : index
      %13 = vector.load %arg7[%c0_10, %c0_11] : memref<128x128xf32, #tpu.memory_space<vmem>>, vector<128x128xf32>
      %c0_12 = arith.constant 0 : index
      %c0_13 = arith.constant 0 : index
      %14 = vector.load %arg5[%c0_12, %c0_13] : memref<1x128xf32, #tpu.memory_space<vmem>>, vector<1x128xf32>
      %15 = vector.broadcast %14 : vector<1x128xf32> to vector<128x128xf32>
      %16 = arith.addf %13, %15 : vector<128x128xf32>
      %c0_14 = arith.constant 0 : index
      %c0_15 = arith.constant 0 : index
      %17 = vector.load %arg6[%c0_14, %c0_15] : memref<128x128xf32, #tpu.memory_space<vmem>>, vector<128x128xf32>
      tpu.vector_store %arg6[%c0_14, %c0_15], %16 {strides = array<i32>} : memref<128x128xf32, #tpu.memory_space<vmem>>, vector<128x128xf32>,
    } else {
    }
    return
  }
  func.func @transform_0(%arg0: i32, %arg1: i32, %arg2: i32) -> (i32, i32) {
    %c0_i32 = arith.constant 0 : i32
    return %arg1, %arg2 : i32, i32
  }
  func.func @transform_1(%arg0: i32, %arg1: i32, %arg2: i32) -> (i32, i32) {
    %c0_i32 = arith.constant 0 : i32
    return %arg2, %arg0 : i32, i32
  }
  func.func @transform_2(%arg0: i32, %arg1: i32, %arg2: i32) -> (i32, i32) {
    %c0_i32 = arith.constant 0 : i32
    %c0_i32_0 = arith.constant 0 : i32
    return %c0_i32, %arg0 : i32, i32
  }
  func.func @transform_3(%arg0: i32, %arg1: i32, %arg2: i32) -> (i32, i32) {
    %c0_i32 = arith.constant 0 : i32
    return %arg1, %arg0 : i32, i32
  }
}

</mosaic_0001>

<bundles_post_ra>
// kernel: custom_linear_prepared.1
= control target key start
LH: loop header
LB: loop body
LE: loop exit
PB: predicated region body
PF: predicated region fallthrough
CT: control target
= control target key end

     0   :  { %s764_s1 = inlined_call_operand.vmem [shape: bf16[256,128], index: 1, kind: input, shape index: {}]   ;;  %s765_s0 = inlined_call_operand.vmem [shape: f32[128,256], index: 0, kind: input, shape index: {}]   ;;  %s766_s2 = inlined_call_operand.vmem [shape: f32[1,128], index: 2, kind: input, shape index: {}]   ;;  %s767_s3 = inlined_call_operand.vmem [shape: f32[128,128], index: 3, kind: output, shape index: {}]  }
   0x1   :  { %v515_v0 = vld [vmem:[%s764_s1 + $0x40] sm:$0xff]   ;;  %v517_v2 = vld [vmem:[%s764_s1 + $0x48] sm:$0xff]   ;;  %v519_v4 = vld [vmem:[%s764_s1 + $0x50] sm:$0xff]  }
   0x2   :  { %v516_v1 = vld [vmem:[%s764_s1] sm:$0xff]   ;;  %435 = vmatprep.subr.bf16.mxu0 %v515_v0  ;;  %499 = vmatprep.subr.bf16.mxu1 %v515_v0  ;;  %v518_v3 = vld [vmem:[%s764_s1 + $0x8] sm:$0xff]   ;;  %v520_v5 = vld [vmem:[%s764_s1 + $0x10] sm:$0xff]  }
   0x3   :  { %436 = vmatpush3.bf16.msra.mxu0 %v516_v1  ;;  %507 = vmatpush3.bf16.msra.mxu1 %v516_v1  ;;  %v521_v6 = vld [vmem:[%s764_s1 + $0x58] sm:$0xff]   ;;  %v523_v8 = vld [vmem:[%s764_s1 + $0x60] sm:$0xff]   ;;  %v525_v10 = vld [vmem:[%s764_s1 + $0x68] sm:$0xff]  }
   0x4   :  { %437 = vmatprep.subr.bf16.mxu0 %v517_v2  ;;  %500 = vmatprep.subr.bf16.mxu1 %v517_v2  ;;  %v522_v7 = vld [vmem:[%s764_s1 + $0x18] sm:$0xff]   ;;  %v524_v9 = vld [vmem:[%s764_s1 + $0x20] sm:$0xff]   ;;  %v52_v11 = vld [vmem:[%s765_s0 + $0x8] sm:$0xff] }
   0x5   :  { %v54_v12 = vld [vmem:[%s765_s0 + $0x18] sm:$0xff]  ;;  %v68_v13 = vld [vmem:[%s765_s0 + $0x88] sm:$0xff]  ;;  %v527_v18 = vld [vmem:[%s764_s1 + $0x70] sm:$0xff]  }
   0x6   :  { %v84_v14 = vpack.c.bf16 %v54_v12, %v52_v11  ;;  %v70_v15 = vld [vmem:[%s765_s0 + $0x98] sm:$0xff]  ;;  %v526_v17 = vld [vmem:[%s764_s1 + $0x28] sm:$0xff]   ;;  %v528_v19 = vld [vmem:[%s764_s1 + $0x30] sm:$0xff]  }
   0x7   :  { %438 = vmatpush3.bf16.msra.mxu0 %v518_v3  ;;  %508 = vmatpush3.bf16.msra.mxu1 %v518_v3  ;;  %v92_v16 = vpack.c.bf16 %v70_v15, %v68_v13  ;;  %v529_v20 = vld [vmem:[%s764_s1 + $0x78] sm:$0xff]   ;;  %v51_v22 = vld [vmem:[%s765_s0] sm:$0xff]  ;;  %v53_v23 = vld [vmem:[%s765_s0 + $0x10] sm:$0xff] }
   0x8   :  { %439 = vmatprep.subr.bf16.mxu0 %v519_v4  ;;  %501 = vmatprep.subr.bf16.mxu1 %v519_v4  ;;  %v530_v21 = vld [vmem:[%s764_s1 + $0x38] sm:$0xff]   ;;  %v67_v24 = vld [vmem:[%s765_s0 + $0x80] sm:$0xff]  ;;  %v69_v25 = vld [vmem:[%s765_s0 + $0x90] sm:$0xff]  ;;  %v83_v30 = vpack.c.bf16 %v53_v23, %v51_v22 }
   0x9   :  { %259 = vmatprep.mubr.bf16.mxu0 %v84_v14  ;;  %291 = vmatprep.mubr.bf16.mxu1 %v92_v16  ;;  %v56_v26 = vld [vmem:[%s765_s0 + $0x28] sm:$0xff]  ;;  %v58_v27 = vld [vmem:[%s765_s0 + $0x38] sm:$0xff]  ;;  %v91_v31 = vpack.c.bf16 %v69_v25, %v67_v24  ;;  %v55_v34 = vld [vmem:[%s765_s0 + $0x20] sm:$0xff] }
   0xa   :  { %v72_v28 = vld [vmem:[%s765_s0 + $0xa8] sm:$0xff]  ;;  %v74_v29 = vld [vmem:[%s765_s0 + $0xb8] sm:$0xff]  ;;  %v86_v32 = vpack.c.bf16 %v58_v27, %v56_v26  ;;  %v57_v35 = vld [vmem:[%s765_s0 + $0x30] sm:$0xff] }
   0xb   :  { %440 = vmatpush3.bf16.msra.mxu0 %v520_v5  ;;  %509 = vmatpush3.bf16.msra.mxu1 %v520_v5  ;;  %v94_v33 = vpack.c.bf16 %v74_v29, %v72_v28  ;;  %v71_v36 = vld [vmem:[%s765_s0 + $0xa0] sm:$0xff]  ;;  %v73_v37 = vld [vmem:[%s765_s0 + $0xb0] sm:$0xff]  ;;  %v60_v38 = vld [vmem:[%s765_s0 + $0x48] sm:$0xff]  ;;  %v85_v42 = vpack.c.bf16 %v57_v35, %v55_v34 }
   0xc   :  { %441 = vmatprep.subr.bf16.mxu0 %v521_v6  ;;  %502 = vmatprep.subr.bf16.mxu1 %v521_v6  ;;  %v62_v39 = vld [vmem:[%s765_s0 + $0x58] sm:$0xff]  ;;  %v76_v40 = vld [vmem:[%s765_s0 + $0xc8] sm:$0xff]  ;;  %v93_v43 = vpack.c.bf16 %v73_v37, %v71_v36  ;;  %v59_v46 = vld [vmem:[%s765_s0 + $0x40] sm:$0xff] }
   0xd   :  { %v78_v41 = vld [vmem:[%s765_s0 + $0xd8] sm:$0xff]  ;;  %v88_v44 = vpack.c.bf16 %v62_v39, %v60_v38  ;;  %v61_v47 = vld [vmem:[%s765_s0 + $0x50] sm:$0xff]  ;;  %v75_v48 = vld [vmem:[%s765_s0 + $0xc0] sm:$0xff] }
   0xe   :  { %v96_v45 = vpack.c.bf16 %v78_v41, %v76_v40  ;;  %v77_v49 = vld [vmem:[%s765_s0 + $0xd0] sm:$0xff]  ;;  %v64_v50 = vld [vmem:[%s765_s0 + $0x68] sm:$0xff]  ;;  %v66_v51 = vld [vmem:[%s765_s0 + $0x78] sm:$0xff]  ;;  %v87_v54 = vpack.c.bf16 %v61_v47, %v59_v46 }
   0xf   :  { %442 = vmatpush3.bf16.msra.mxu0 %v522_v7  ;;  %510 = vmatpush3.bf16.msra.mxu1 %v522_v7  ;;  %v80_v52 = vld [vmem:[%s765_s0 + $0xe8] sm:$0xff]  ;;  %v82_v53 = vld [vmem:[%s765_s0 + $0xf8] sm:$0xff]  ;;  %v95_v55 = vpack.c.bf16 %v77_v49, %v75_v48  ;;  %v90_v56 = vpack.c.bf16 %v66_v51, %v64_v50  ;;  %v63_v58 = vld [vmem:[%s765_s0 + $0x60] sm:$0xff] }
  0x10   :  { %443 = vmatprep.subr.bf16.mxu0 %v523_v8  ;;  %503 = vmatprep.subr.bf16.mxu1 %v523_v8  ;;  %v98_v57 = vpack.c.bf16 %v82_v53, %v80_v52  ;;  %v65_v59 = vld [vmem:[%s765_s0 + $0x70] sm:$0xff]  ;;  %v79_v60 = vld [vmem:[%s765_s0 + $0xe0] sm:$0xff] }
  0x11   :  { %v81_v61 = vld [vmem:[%s765_s0 + $0xf0] sm:$0xff]  ;;  %v89_v62 = vpack.c.bf16 %v65_v59, %v63_v58  ;;  %v698_v3 = vld [vmem:[%s766_s2] ss:$0 sm:$0xff] }
  0x12   :  { %v97_v63 = vpack.c.bf16 %v81_v61, %v79_v60 }
  0x13   :  { %444 = vmatpush3.bf16.msra.mxu0 %v524_v9  ;;  %511 = vmatpush3.bf16.msra.mxu1 %v524_v9 }
  0x14   :  { %445 = vmatprep.subr.bf16.mxu0 %v525_v10  ;;  %504 = vmatprep.subr.bf16.mxu1 %v525_v10 }
  0x17   :  { %446 = vmatpush3.bf16.msra.mxu0 %v526_v17  ;;  %512 = vmatpush3.bf16.msra.mxu1 %v526_v17 }
  0x18   :  { %447 = vmatprep.subr.bf16.mxu0 %v527_v18  ;;  %505 = vmatprep.subr.bf16.mxu1 %v527_v18 }
  0x1b   :  { %448 = vmatpush3.bf16.msra.mxu0 %v528_v19  ;;  %513 = vmatpush3.bf16.msra.mxu1 %v528_v19 }
  0x1c   :  { %449 = vmatprep.subr.bf16.mxu0 %v529_v20  ;;  %506 = vmatprep.subr.bf16.mxu1 %v529_v20 }
  0x1f   :  { %450 = vmatpush3.bf16.msra.mxu0 %v530_v21  ;;  %514 = vmatpush3.bf16.msra.mxu1 %v530_v21 }
  0x22   :  { %260 = vmatmul.mubr.bf16.vlgmr.msra.gmra.mrb[0].mxu0 %v83_v30  ;;  %292 = vmatmul.mubr.bf16.vlgmr.msra.gmra.mrb[0].mxu1 %v91_v31 }
  0x23   :  { %267 = vmatprep.mubr.bf16.mxu0 %v86_v32  ;;  %299 = vmatprep.mubr.bf16.mxu1 %v94_v33 }
  0x2a   :  { %268 = vmatmul.mubr.bf16.gmra.mrb[4].mxu0 %v85_v42  ;;  %300 = vmatmul.mubr.bf16.gmra.mrb[4].mxu1 %v93_v43 }
  0x2b   :  { %275 = vmatprep.mubr.bf16.mxu0 %v88_v44  ;;  %307 = vmatprep.mubr.bf16.mxu1 %v96_v45 }
  0x32   :  { %276 = vmatmul.mubr.bf16.gmra.mrb[8].mxu0 %v87_v54  ;;  %308 = vmatmul.mubr.bf16.gmra.mrb[8].mxu1 %v95_v55 }
  0x33   :  { %283 = vmatprep.mubr.bf16.mxu0 %v90_v56  ;;  %315 = vmatprep.mubr.bf16.mxu1 %v98_v57 }
  0x3a   :  { %284 = vmatmul.mubr.bf16.gmra.mrb[12].mxu0 %v89_v62  ;;  %316 = vmatmul.mubr.bf16.gmra.mrb[12].mxu1 %v97_v63 }
  0xf5   :  { %v451_v0 = vpop.f32.mrb[0].mxu0  ;;  %v475_v1 = vpop.f32.mrb[0].mxu1 }
  0xf6   :  { %v452_v2 = vpop.f32.mrb[1].mxu0  ;;  %v476_v4 = vpop.f32.mrb[1].mxu1 }
  0xf7   :  { %v453_v5 = vadd.f32 %v452_v2, %v451_v0  ;;  %v477_v6 = vadd.f32 %v476_v4, %v475_v1  ;;  %v454_v7 = vpop.f32.mrb[2].mxu0  ;;  %v478_v8 = vpop.f32.mrb[2].mxu1 }
  0xf8   :  { %v455_v9 = vpop.f32.mrb[3].mxu0  ;;  %v479_v10 = vpop.f32.mrb[3].mxu1 }
  0xf9   :  { %v382_v11 = vadd.f32 %v453_v5, %v698_v3  ;;  %v390_v12 = vadd.f32 %v477_v6, %v698_v3  ;;  %v456_v13 = vadd.f32 %v455_v9, %v454_v7  ;;  %v480_v14 = vadd.f32 %v479_v10, %v478_v8 }
  0xfb   :  { %398 = vst [vmem:[%s767_s3] sm:$0xff] %v382_v11  ;;  %406 = vst [vmem:[%s767_s3 + $0x40] sm:$0xff] %v390_v12  ;;  %v383_v15 = vadd.f32 %v456_v13, %v698_v3  ;;  %v391_v16 = vadd.f32 %v480_v14, %v698_v3 }
  0xfd   :  { %399 = vst [vmem:[%s767_s3 + $0x8] sm:$0xff] %v383_v15  ;;  %407 = vst [vmem:[%s767_s3 + $0x48] sm:$0xff] %v391_v16  ;;  %v457_v17 = vpop.f32.mrb[4].mxu0  ;;  %v481_v18 = vpop.f32.mrb[4].mxu1 }
  0xfe   :  { %v458_v19 = vpop.f32.mrb[5].mxu0  ;;  %v482_v20 = vpop.f32.mrb[5].mxu1 }
  0xff   :  { %v459_v21 = vadd.f32 %v458_v19, %v457_v17  ;;  %v483_v22 = vadd.f32 %v482_v20, %v481_v18  ;;  %v460_v23 = vpop.f32.mrb[6].mxu0  ;;  %v484_v24 = vpop.f32.mrb[6].mxu1 }
 0x100   :  { %v461_v25 = vpop.f32.mrb[7].mxu0  ;;  %v485_v26 = vpop.f32.mrb[7].mxu1 }
 0x101   :  { %v384_v27 = vadd.f32 %v459_v21, %v698_v3  ;;  %v392_v28 = vadd.f32 %v483_v22, %v698_v3  ;;  %v462_v29 = vadd.f32 %v461_v25, %v460_v23  ;;  %v486_v30 = vadd.f32 %v485_v26, %v484_v24 }
 0x103   :  { %400 = vst [vmem:[%s767_s3 + $0x10] sm:$0xff] %v384_v27  ;;  %408 = vst [vmem:[%s767_s3 + $0x50] sm:$0xff] %v392_v28  ;;  %v385_v31 = vadd.f32 %v462_v29, %v698_v3  ;;  %v393_v32 = vadd.f32 %v486_v30, %v698_v3 }
 0x105   :  { %401 = vst [vmem:[%s767_s3 + $0x18] sm:$0xff] %v385_v31  ;;  %409 = vst [vmem:[%s767_s3 + $0x58] sm:$0xff] %v393_v32  ;;  %v463_v33 = vpop.f32.mrb[8].mxu0  ;;  %v487_v34 = vpop.f32.mrb[8].mxu1 }
 0x106   :  { %v464_v35 = vpop.f32.mrb[9].mxu0  ;;  %v488_v36 = vpop.f32.mrb[9].mxu1 }
 0x107   :  { %v465_v37 = vadd.f32 %v464_v35, %v463_v33  ;;  %v489_v38 = vadd.f32 %v488_v36, %v487_v34  ;;  %v466_v39 = vpop.f32.mrb[10].mxu0  ;;  %v490_v40 = vpop.f32.mrb[10].mxu1 }
 0x108   :  { %v467_v41 = vpop.f32.mrb[11].mxu0  ;;  %v491_v42 = vpop.f32.mrb[11].mxu1 }
 0x109   :  { %v386_v43 = vadd.f32 %v465_v37, %v698_v3  ;;  %v394_v44 = vadd.f32 %v489_v38, %v698_v3  ;;  %v468_v45 = vadd.f32 %v467_v41, %v466_v39  ;;  %v492_v46 = vadd.f32 %v491_v42, %v490_v40 }
 0x10b   :  { %402 = vst [vmem:[%s767_s3 + $0x20] sm:$0xff] %v386_v43  ;;  %410 = vst [vmem:[%s767_s3 + $0x60] sm:$0xff] %v394_v44  ;;  %v387_v47 = vadd.f32 %v468_v45, %v698_v3  ;;  %v395_v48 = vadd.f32 %v492_v46, %v698_v3 }
 0x10d   :  { %403 = vst [vmem:[%s767_s3 + $0x28] sm:$0xff] %v387_v47  ;;  %411 = vst [vmem:[%s767_s3 + $0x68] sm:$0xff] %v395_v48  ;;  %v469_v49 = vpop.f32.mrb[12].mxu0  ;;  %v493_v50 = vpop.f32.mrb[12].mxu1 }
 0x10e   :  { %v470_v51 = vpop.f32.mrb[13].mxu0  ;;  %v494_v52 = vpop.f32.mrb[13].mxu1 }
 0x10f   :  { %v471_v53 = vadd.f32 %v470_v51, %v469_v49  ;;  %v495_v54 = vadd.f32 %v494_v52, %v493_v50  ;;  %v472_v55 = vpop.f32.mrb[14].mxu0  ;;  %v496_v56 = vpop.f32.mrb[14].mxu1 }
 0x110   :  { %v473_v57 = vpop.f32.mrb[15].mxu0  ;;  %v497_v58 = vpop.f32.mrb[15].mxu1 }
 0x111   :  { %v388_v59 = vadd.f32 %v471_v53, %v698_v3  ;;  %v396_v60 = vadd.f32 %v495_v54, %v698_v3  ;;  %v474_v61 = vadd.f32 %v473_v57, %v472_v55  ;;  %v498_v62 = vadd.f32 %v497_v58, %v496_v56 }
 0x113   :  { %404 = vst [vmem:[%s767_s3 + $0x30] sm:$0xff] %v388_v59  ;;  %412 = vst [vmem:[%s767_s3 + $0x70] sm:$0xff] %v396_v60  ;;  %v389_v63 = vadd.f32 %v474_v61, %v698_v3  ;;  %v397_v0 = vadd.f32 %v498_v62, %v698_v3 }
 0x115   :  { %405 = vst [vmem:[%s767_s3 + $0x38] sm:$0xff] %v389_v63  ;;  %413 = vst [vmem:[%s767_s3 + $0x78] sm:$0xff] %v397_v0 }

</bundles_post_ra>
